<compile_context>
chip_gen: v7x
topology: tpu7x:2x2x1
jax: 0.10.0
libtpu: 0.0.40
codegen_flags: <defaults>
</compile_context>

<pallas_src>
import jax
import jax.numpy as jnp
from jax import lax
from jax.experimental import pallas as pl
from jax.experimental.pallas import tpu as pltpu


def _round_up(x, m):
    return ((x + m - 1) // m) * m


def _embed_onehot_kernel(idx_ref, table_ref, out_ref):
    # idx_ref   : VMEM (TN, 1) int32   -- position ids for this tile (column vector)
    # table_ref : VMEM (V, D)  float32 -- full embedding table (resident, single buffer)
    # out_ref   : VMEM (TN, D) float32 -- gathered rows for this tile
    tn = out_ref.shape[0]
    v = table_ref.shape[0]

    ids = idx_ref[...]                                    # (TN, 1) int32
    cols = lax.broadcasted_iota(jnp.int32, (tn, v), 1)    # (TN, V) column ids
    one_hot = (ids == cols).astype(table_ref.dtype)       # (TN, V) exact 0.0 / 1.0

    # Single MXU matmul per tile: (TN, V) @ (V, D) -> (TN, D); each output row is
    # 1.0 * the selected table row (full f32 precision inside Mosaic).
    out_ref[...] = jnp.dot(
        one_hot, table_ref[...], preferred_element_type=jnp.float32
    ).astype(out_ref.dtype)


def positional_embedding(idx, table, *, tile_rows=None):
    """idx: (B, S) integer positions, table: (V, D) float32 -> (B, S, D) float32."""
    B, S = idx.shape
    V, D = table.shape
    N = B * S

    if tile_rows is None:
        # Large enough to amortize per-step overhead (target <=1024 rows/step),
        # no larger than needed, and >= 2 tiles whenever N >= 16 so both v7x
        # TensorCores get work under dimension_semantics=("parallel",).
        tile_rows = min(1024, max(8, _round_up(pl.cdiv(N, 2), 8)))
    tile_rows = max(8, _round_up(tile_rows, 8))

    num_tiles = pl.cdiv(N, tile_rows)

    # Indices as an (N8, 1) sublane-major column so the one-hot broadcast against
    # a lane-iota is free on the VPU.  Pad only to a sublane multiple (8); the
    # padded rows are never stored (output boundary block is clipped).
    n8 = _round_up(N, 8)
    idx_col = idx.reshape(N).astype(jnp.int32)
    if n8 != N:
        idx_col = jnp.pad(idx_col, (0, n8 - N))
    idx_col = idx_col.reshape(n8, 1)

    grid_spec = pltpu.PrefetchScalarGridSpec(
        num_scalar_prefetch=0,
        grid=(num_tiles,),
        in_specs=[
            # per-tile index column (lane-sparse, but tiny; keeps broadcast free)
            pl.BlockSpec((tile_rows, 1), lambda i: (i, 0)),
            # full table resident in VMEM; constant index_map -> single buffer
            pl.BlockSpec((V, D), lambda i: (0, 0), pipeline_mode=pl.Buffered(1)),
        ],
        out_specs=pl.BlockSpec((tile_rows, D), lambda i: (i, 0)),
    )

    # VMEM footprint: table (x1, single-buffered) + double-buffered output tiles
    # + one-hot temporary + idx tiles; generous headroom, clamped to v7x physical.
    est_vmem = (
        V * D * 4
        + 2 * tile_rows * D * 4
        + tile_rows * V * 4
        + 2 * tile_rows * 4 * 8
    )
    vmem_limit = int(min(64 << 20, max(32 << 20, 2 * est_vmem)))

    cost = pl.CostEstimate(
        flops=2 * num_tiles * tile_rows * V * D,       # one-hot matmul per tile
        transcendentals=0,
        bytes_accessed=N * 4 + V * D * 4 + N * D * 4,  # idx + table + output
    )

    out_flat = pl.pallas_call(
        _embed_onehot_kernel,
        out_shape=jax.ShapeDtypeStruct((N, D), table.dtype),
        grid_spec=grid_spec,
        compiler_params=pltpu.CompilerParams(
            dimension_semantics=("parallel",),
            vmem_limit_bytes=vmem_limit,
        ),
        cost_estimate=cost,
    )(idx_col, table)

    # (N, D) -> (B, S, D) is a metadata-only reshape (no slice copy anymore).
    return out_flat.reshape(B, S, D)


if __name__ == "__main__":
    key = jax.random.PRNGKey(0)
    k_tab, k_idx = jax.random.split(key)

    max_seq_len = 64   # V
    embed_dim = 128    # D (lane-aligned)
    batch, seq = 2, 8

    # nn.Embedding default init: weight ~ N(0, 1)
    table = jax.random.normal(k_tab, (max_seq_len, embed_dim), dtype=jnp.float32)
    X = jax.random.randint(k_idx, (batch, seq), 0, max_seq_len, dtype=jnp.int32)

    out = positional_embedding(X, table)
    out = jax.block_until_ready(out)

    # reference check against plain JAX gather (tight tolerance validates that the
    # in-kernel f32 matmul path is not bf16-truncated)
    ref = table[X]
    assert out.shape == (batch, seq, embed_dim)
    assert out.dtype == jnp.float32
    assert jnp.allclose(out, ref, rtol=1e-6, atol=1e-6), \
        "mismatch vs reference embedding lookup"

    print("KERNEL_OK")
</pallas_src>

<mosaic_0001>
module attributes {stable_mosaic.version = 11 : i64} {
  func.func @_embed_onehot_kernel(%arg0: i32, %arg1: memref<8x1xi32, #tpu.memory_space<vmem>>, %arg2: memref<64x128xf32, #tpu.memory_space<vmem>>, %arg3: memref<8x128xf32, #tpu.memory_space<vmem>>) attributes {dimension_semantics = [#tpu.dimension_semantics<parallel>], iteration_bounds = array<i64: 2>, scalar_prefetch = 0 : i64, scratch_operands = 0 : i64, tpu.core_type = #tpu.core_type<tc>, window_params = [{transform_indices = @transform_0, window_bounds = array<i64: 8, 1>}, {pipeline_mode = #tpu.pipeline_mode<synchronous>, transform_indices = @transform_1, window_bounds = array<i64: 64, 128>}, {transform_indices = @transform_2, window_bounds = array<i64: 8, 128>}]} {
    %c0 = arith.constant 0 : index
    %c0_0 = arith.constant 0 : index
    %0 = vector.load %arg1[%c0, %c0_0] : memref<8x1xi32, #tpu.memory_space<vmem>>, vector<8x1xi32>
    %1 = tpu.iota {dimensions = array<i32: 1>} : vector<8x64xi32>
    %2 = vector.broadcast %0 : vector<8x1xi32> to vector<8x64xi32>
    %3 = arith.cmpi eq, %2, %1 : vector<8x64xi32>
    %4 = arith.extui %3 : vector<8x64xi1> to vector<8x64xi32>
    %5 = arith.sitofp %4 : vector<8x64xi32> to vector<8x64xf32>
    %c0_1 = arith.constant 0 : index
    %c0_2 = arith.constant 0 : index
    %6 = vector.load %arg2[%c0_1, %c0_2] : memref<64x128xf32, #tpu.memory_space<vmem>>, vector<64x128xf32>
    %cst = arith.constant dense<0.000000e+00> : vector<8x128xf32>
    %7 = tpu.matmul %5, %6, %cst {dimension_numbers = #tpu.dot_dimension_numbers<[1], [0], [0], [1], [0, 0, 1, 1], [], []>} : vector<8x64xf32>, vector<64x128xf32>, vector<8x128xf32> -> vector<8x128xf32>
    %c0_3 = arith.constant 0 : index
    %c0_4 = arith.constant 0 : index
    %8 = vector.load %arg3[%c0_3, %c0_4] : memref<8x128xf32, #tpu.memory_space<vmem>>, vector<8x128xf32>
    tpu.vector_store %arg3[%c0_3, %c0_4], %7 {strides = array<i32>} : memref<8x128xf32, #tpu.memory_space<vmem>>, vector<8x128xf32>,
    return
  }
  func.func @transform_0(%arg0: i32) -> (i32, i32) {
    %c0_i32 = arith.constant 0 : i32
    %c0_i32_0 = arith.constant 0 : i32
    return %arg0, %c0_i32 : i32, i32
  }
  func.func @transform_1(%arg0: i32) -> (i32, i32) {
    %c0_i32 = arith.constant 0 : i32
    %c0_i32_0 = arith.constant 0 : i32
    %c0_i32_1 = arith.constant 0 : i32
    return %c0_i32, %c0_i32_0 : i32, i32
  }
  func.func @transform_2(%arg0: i32) -> (i32, i32) {
    %c0_i32 = arith.constant 0 : i32
    %c0_i32_0 = arith.constant 0 : i32
    return %arg0, %c0_i32 : i32, i32
  }
}

</mosaic_0001>

<bundles_post_ra>
// kernel: tpu_custom_call.1
= control target key start
LH: loop header
LB: loop body
LE: loop exit
PB: predicated region body
PF: predicated region fallthrough
CT: control target
= control target key end

     0   :  { %7 = vsyncpa [#allocation3], 0  ;;  %s696_s0 = inlined_call_operand.vmem [shape: s32[16,1], index: 0, kind: input, shape index: {}]   ;;  %s697_s1 = inlined_call_operand.hbm [shape: f32[64,128], index: 1, kind: input, shape index: {}]   ;;  %s698_s2 = inlined_call_operand.hbm [shape: f32[16,128], index: 2, kind: output, shape index: {}]  }
   0x1   :  { %8 = vsyncpa [#allocation4], 0 }
   0x2   :  { %10 = vsyncpa [#allocation4 + $0x1], 0  ;;  %s561_s9 = smov 0   ;;  %s563_s10 = smov 0  }
   0x3   :  { %s565_s11 = smov 0   ;;  %s567_s12 = smov 0  }
   0x4 LB: > { %s582_s13 = sadd.s32 4294967295, %s536_s12   ;;  %s331_s14 = sadd.s32 4294967294, %s536_s12   ;;  %s536_s12 = sphi %s567_s12, %s714_s12   ;;  %s532_s11 = sphi %s565_s11, %s713_s11   ;;  %s528_s10 = sphi %s563_s10, %s712_s10   ;;  %s524_s9 = sphi %s561_s9, %s711_s9  }
   0x5   : > { %s586_s15 = sadd.s32 1, %s536_s12   ;;  %s70_s16 = sadd.s32 1, %s532_s11 }
   0x6   : > { %s67_s17 = ssub.s32 %s536_s12, %s586_s15  ;;  %p80_p0 = scmp.ne.s32.totalorder %s532_s11, %s528_s10 }
   0x7   : > { %p68_p1 = scmp.eq.s32.totalorder %s67_s17, 0  ;;  %p81_p2 = scmp.eq.s32.totalorder %s582_s13, 1 }
   0x8   : > { %p86_p3 = scmp.ne.s32.totalorder %s528_s10, %s524_s9  ;;  %p87_p4 = scmp.eq.s32.totalorder %s331_s14, 1 }
   0x9   : > { %s597_s18 = scalar_select %p68_p1, %s532_s11, %s70_s16  }
   0xa   : > { %p599_p5 = por %p81_p2, %p80_p0  ;;  %p603_p6 = por %p87_p4, %p86_p3 }
   0xb   : > { %p332_p7 = scmp.ge.s32.totalorder %s536_s12, 1  ;;  %p94_p8 = scmp.lt.s32.totalorder %s536_s12, 3 }
   0xc   : > { %s702_s19 = scalar_select %p599_p5, 1, 0 }
   0xd   : > { %s703_s20 = scalar_select %p603_p6, 1, 0 }
   0xe   : > { %p699_p9 = scmp.eq.s32.totalorder %s582_s13, 0  ;;  %p610_p10 = pnand %p332_p7, %p94_p8 }
   0xf   : > { %s538_s22 = smov [#allocation2]   ;;  %s442_s27 = scalar_lea.hbm %s697_s1, 1024 }
  0x10   : > { %s704_s21 = scalar_select %p610_p10, 1, 0 }
  0x11   : > { %s106_s23 = sshll.u32 %s538_s22, 4  ;;  %p391_p11 = pneg %p610_p10  ;;  %s107_s23 = int_to_ptr.vmem [resolvable:$true] %s106_s23 }
  0x12   : > { %p443_p13 = scmp.ne.s32.totalorder %s697_s1, %s442_s27  ;;  %p449_p3 = scmp.lt.u32.totalorder %s442_s27, %s697_s1 }
  0x13   : > { %p618_p12 = pnand %p699_p9, %p391_p11 }
  0x15   : > { %p444_p0 = pneg %p618_p12 }
  0x17   : > { %p445_p1 = pnand %p444_p0, %p443_p13 }
  0x19   : > { %p446_p2 = pneg %p445_p1 }
  0x1b   : > { %p451_p4 = pnand %p449_p3, %p446_p2 }
  0x1d   : > { %454 = shalt.err (!%p451_p4)
}
  0x1e   : > { %s455_s4 = scalar_lea.vmem %s107_s23, 1024  ;;  %p463_p9 = scmp.lt.s32.totalorder %s107_s23, %s107_s23 }
  0x1f   : > { %p456_p7 = scmp.ne.s32.totalorder %s107_s23, %s455_s4  ;;  %p464_p6 = scmp.lt.s32.totalorder %s455_s4, %s455_s4 }
  0x21   : > { %p458_p8 = pnand %p456_p7, %p444_p0  ;;  %p465_p5 = por %p464_p6, %p463_p9 }
  0x23   : > { %p459_p11 = pneg %p458_p8 }
  0x25   : > { %p466_p10 = pnand %p465_p5, %p459_p11 }
  0x27   : > { %469 = shalt.err (!%p466_p10)
}
  0x28   : > { %s539_s5 = smov 128   ;;  %s540_s6 = smov 8  }
  0x29   : > { %394 = dma.hbm_to_vmem [thread:$0]  (!%p618_p12), %s697_s1, 1024, %s107_s23, [#allocation3], %s539_s5, %s539_s5, %s540_s6  }
  0x2a   : > { %p706_p13 = scmp.ne.s32.totalorder %s704_s21, 0 }
  0x2b   : > { %p707_p1 = scmp.eq.s32.totalorder (!%p706_p13), %s582_s13, 0 }
  0x2c   : > { %129 = sbr.rel (%p706_p13) target bundleno = 415 (0x19f), region = 28 }
  0x33   : > { %515 = dma.done.wait (%p707_p1), [#allocation3], 1024   ;;  %p708_p0 = pmov %p707_p1 }
  0x34   : > { %p150_p5 = scmp.lt.s32.totalorder %s582_s13, 1  ;;  %v541_v0 = vmov 0   ;;  %v542_v1 = vmov 0.0|0.0   ;;  %v163_v3 = vld [vmem:[#allocation2] sm:$0xff]  ;;  %v164_v4 = vld [vmem:[#allocation2 + $0x8] sm:$0xff]  ;;  %v165_v6 = vld [vmem:[#allocation2 + $0x10] sm:$0xff]  ;;  %v155_v16 = vlaneseq }
  0x35   : > { %517 = vsyncadd (%p708_p0), [#allocation3], 4294966272  ;;  %441 = vset.pattern.permute.xlu0 %v541_v0  ;;  %373 = vmatprep.subr.bf16.mxu0 %v542_v1  ;;  %v374_v5 = vpack.c.bf16 %v164_v4, %v163_v3  ;;  %v166_v7 = vld [vmem:[#allocation2 + $0x18] sm:$0xff]  ;;  %vm543_vm0 = vmmov 0   ;;  %v544_v8 = vmov 0.0   ;;  %v167_v10 = vld [vmem:[#allocation2 + $0x20] sm:$0xff] }
  0x36   : > { %s151_s14 = scalar_select %p150_p5, %s582_s13, 1  ;;  %370 = vmatprep.mubr.msk.f32.mxu0 %vm543_vm0, %v544_v8  ;;  %v377_v9 = vpack.c.bf16 %v166_v7, %v165_v6  ;;  %v168_v11 = vld [vmem:[#allocation2 + $0x28] sm:$0xff]  ;;  %v169_v13 = vld [vmem:[#allocation2 + $0x30] sm:$0xff]  ;;  %v170_v14 = vld [vmem:[#allocation2 + $0x38] sm:$0xff]  ;;  %v156_v17 = vand.u32 127, %v155_v16  ;;  %vm171_vm1 = vcmask 523264  }
  0x37   : > { %375 = vmatpush3.bf16.msra.mxu0 %v374_v5  ;;  %v380_v12 = vpack.c.bf16 %v168_v11, %v167_v10  ;;  %v383_v15 = vpack.c.bf16 %v170_v14, %v169_v13  ;;  %s147_s23 = sand.u32 1, %s528_s10   ;;  %s342_s27 = sshll.u32 %s582_s13, 7 }
  0x38   : > { %s338_s16 = sshll.u32 %s151_s14, 3  ;;  %376 = vmatprep.subr.bf16.mxu0 %v542_v1  ;;  %s337_s24 = sshll.u32 %s147_s23, 3 }
  0x39   : > { %s153_s21 = scalar_lea.vmem %s696_s0, %s338_s16  ;;  %s149_s25 = scalar_lea.vmem [#allocation5], %s337_s24 }
  0x3a   : > { %v154_v2 = vld [vmem:[%s153_s21] sm:$0xff]  ;;  %s260_s26 = sshll.u32 %s149_s25, 4  ;;  %s656_s30 = scalar_lea.hbm %s698_s2, %s342_s27  ;;  %s651_s26 = int_to_ptr.vmem [resolvable:$true] %s260_s26 }
  0x3b   : > { %158 = vperm.xlu0 %441, %v154_v2   ;;  %378 = vmatpush3.bf16.msra.mxu0 %v377_v9  ;;  %s247_s3 = scalar_lea.sflag [#allocation4], %s147_s23  ;;  %s470_s4 = scalar_lea.vmem %s651_s26, 128 }
  0x3c   : > { %379 = vmatprep.subr.bf16.mxu0 %v542_v1  ;;  %p471_p6 = scmp.ne.s32.totalorder %s651_s26, %s470_s4  ;;  %p709_p9 = scmp.ne.s32.totalorder %s702_s19, 0 }
  0x3d   : > { %s545_s13 = smov [#allocation5]  }
  0x3e   : > { %p472_p10 = pnand %p471_p6, %p709_p9  ;;  %s474_s5 = sshll.u32 %s545_s13, 4  ;;  %s475_s5 = int_to_ptr.vmem [resolvable:$false] %s474_s5 }
  0x3f   : > { %381 = vmatpush3.bf16.msra.mxu0 %v380_v12  ;;  %s476_s6 = scalar_lea.vmem %s475_s5, 256  ;;  %p477_p2 = scmp.lt.s32.totalorder %s651_s26, %s475_s5 }
  0x40   : > { %382 = vmatprep.subr.bf16.mxu0 %v542_v1  ;;  %p473_p12 = pneg %p472_p10  ;;  %p478_p3 = scmp.lt.s32.totalorder %s476_s6, %s470_s4 }
  0x42   : > { %p479_p4 = por %p478_p3, %p477_p2 }
  0x43   : > { %384 = vmatpush3.bf16.msra.mxu0 %v383_v15 }
  0x44   : > { %p480_p7 = pnand %p479_p4, %p473_p12 }
  0xba   : > { %v159_v18 = vpop.permute.xlu0 %158 }
  0xbb   : > { %vm160_vm2 = vcmp.eq.s32.totalorder %v159_v18, %v156_v17 }
  0xbc   : > { %v339_v19 = vsel %vm160_vm2, 1.0, %v544_v8 }
  0xbd   : > { %371 = vmatmul.mubr.msk.f32.vlgmr.msra.gmra.mrb[0].mxu0 %vm171_vm1, %v339_v19 }
 0x190   : > { %v241_v20 = vpop.f32.mrb[0].mxu0 }
 0x191   : > { %245 = vst [vmem:[%s149_s25] sm:$0xff] %v241_v20  ;;  %v372_v21 = vpop.f32.mrb[1].mxu0 }
 0x192   : > { %483 = shalt.err (!%p480_p7)
}
 0x193   : > { %s484_s7 = scalar_lea.hbm %s656_s30, 128  ;;  %s488_s16 = scalar_lea.hbm %s698_s2, 256 }
 0x194   : > { %p485_p8 = scmp.ne.s32.totalorder %s656_s30, %s484_s7  ;;  %p489_p1 = scmp.lt.u32.totalorder %s656_s30, %s698_s2 }
 0x195   : > { %p490_p0 = scmp.lt.u32.totalorder %s488_s16, %s484_s7  ;;  %p492_p6 = scmp.lt.u32.totalorder %s484_s7, %s656_s30 }
 0x196   : > { %p486_p11 = pnand %p485_p8, %p709_p9 }
 0x197   : > { %p491_p5 = por %p490_p0, %p489_p1 }
 0x198   : > { %p487_p13 = pneg %p486_p11 }
 0x199   : > { %p493_p10 = por %p492_p6, %p491_p5 }
 0x19b   : > { %p494_p12 = pnand %p493_p10, %p487_p13 }
 0x19d   : > { %497 = shalt.err (!%p494_p12)
}
 0x19e   : > { %389 = dma.vmem_to_hbm [thread:$0]  (%p709_p9), %s651_s26, 128, %s656_s30, %s247_s3  }
 0x19f PF: > { %p401_p2 = scmp.ge.s32.totalorder %s536_s12, 2  ;;  %s272_s21 = sand.u32 1, %s524_s9  }
 0x1a0   : > { %p710_p3 = scmp.ne.s32.totalorder %s703_s20, 0  ;;  %s273_s23 = scalar_lea.sflag [#allocation4], %s272_s21 }
 0x1a2   : > { %p396_p4 = pnand %p401_p2, %p710_p3 }
 0x1a4   : > { %519 = dma.done.wait (!%p396_p4), %s273_s23, 128  }
 0x1a5   : > { %521 = vsyncadd (!%p396_p4), %s273_s23, 4294967168  ;;  %p13_p7 = scmp.ge.s32.totalorder %s586_s15, 4   ;;  %s711_s9 = smov %s528_s10 }
 0x1a6   : > { %s712_s10 = smov %s532_s11  ;;  %s713_s11 = smov %s597_s18 }
 0x1a7   : > { %s714_s12 = smov %s586_s15  ;;  %15 = sbr.rel (!%p13_p7) target bundleno = 4 (0x4), region = 68 }
 0x1ae   :  { %278 = vsyncpa [#allocation3], 1 }
 0x1af   :  { %280 = vsyncpa [#allocation3 + $0x1], 1 }
 0x1b0   :  { %281 = vsyncpa [#allocation4], 1 }
 0x1b1   :  { %283 = vsyncpa [#allocation4 + $0x1], 1 }

</bundles_post_ra>
